<compile_context>
chip_gen: v7x
topology: tpu7x:2x2x1
jax: 0.10.0
libtpu: 0.0.40
codegen_flags: <defaults>
</compile_context>

<pallas_src>
import math
import functools

import jax
import jax.numpy as jnp
from jax.experimental import pallas as pl
from jax.experimental.pallas import tpu as pltpu

LN_EPS = 1e-5


def _layernorm(h, gamma, beta):
    mu = jnp.mean(h, axis=-1, keepdims=True)
    var = jnp.mean((h - mu) ** 2, axis=-1, keepdims=True)
    return (h - mu) * jax.lax.rsqrt(var + LN_EPS) * gamma + beta


def _gelu_tanh(u):
    c = math.sqrt(2.0 / math.pi)
    return 0.5 * u * (1.0 + jnp.tanh(c * (u + 0.044715 * u * u * u)))


# --------------------------------------------------------------------------------------
# Kernel 1: LN1 + QKV projection, tiled over (batch, row-tile).  Output is bf16 and the
# Q columns are pre-scaled by 1/sqrt(D) (folded into the weights by the wrapper).
# --------------------------------------------------------------------------------------
def ln_qkv_kernel(x_ref, g1_ref, b1_ref, wqkv_ref, bqkv_ref, qkv_ref):
    x = x_ref[0].astype(jnp.float32)                       # (Tq, C)
    h = _layernorm(x, g1_ref[0], b1_ref[0])                # f32 element-wise math
    qkv = jnp.dot(h.astype(jnp.bfloat16), wqkv_ref[...],   # bf16 x bf16 -> f32 acc
                  preferred_element_type=jnp.float32) + bqkv_ref[0]
    qkv_ref[0] = qkv.astype(qkv_ref.dtype)


# --------------------------------------------------------------------------------------
# Kernel 2: causal attention (per q row-tile, per head) + output projection + residual 1
#           + LN2 + MLP + residual 2.  Grid = (B, num_row_tiles), both parallel.
# --------------------------------------------------------------------------------------
def attn_mlp_kernel(x_ref, qkvq_ref, qkv_ref,
                    wpr_ref, bpr_ref, g2_ref, b2_ref,
                    wfc_ref, bfc_ref, wfp_ref, bfp_ref,
                    o_ref, yacc_ref, *, n_head):
    x = x_ref[0].astype(jnp.float32)                       # (Tq, C) residual stream
    tq, C = x.shape
    D = C // n_head
    T = qkv_ref.shape[1]                                   # full sequence length

    i = pl.program_id(1)
    row0 = i * tq
    rows = row0 + jax.lax.broadcasted_iota(jnp.int32, (tq, T), 0)
    cols = jax.lax.broadcasted_iota(jnp.int32, (tq, T), 1)
    causal = cols <= rows

    # Accumulate the attention output *after* projection, head by head (no lane concat).
    yacc_ref[...] = jnp.zeros_like(yacc_ref)
    # TODO(synk): full flash-style KV tiling with causal-tile skip (online softmax) for very long T.
    for hd in range(n_head):
        qh = qkvq_ref[0, :, hd * D:(hd + 1) * D]                      # (Tq, D) bf16, pre-scaled
        kh = qkv_ref[0, :, C + hd * D:C + (hd + 1) * D]               # (T, D) bf16
        vh = qkv_ref[0, :, 2 * C + hd * D:2 * C + (hd + 1) * D]       # (T, D) bf16

        # Q @ K^T without materializing a transpose: contract last dims directly.
        s = jax.lax.dot_general(qh, kh, (((1,), (1,)), ((), ())),
                                preferred_element_type=jnp.float32)   # (Tq, T) f32
        s = jnp.where(causal, s, -1e30)                               # finite large-negative mask
        m = jnp.max(s, axis=-1, keepdims=True)
        p = jnp.exp(s - m)
        p = p * pl.reciprocal(jnp.sum(p, axis=-1, keepdims=True), approx=True)
        ph = jnp.dot(p.astype(jnp.bfloat16), vh,
                     preferred_element_type=jnp.float32)              # (Tq, D)
        # Fold the output projection into the head loop: (Tq, D) @ (D, C) accumulated in f32.
        yacc_ref[...] += jnp.dot(ph.astype(jnp.bfloat16),
                                 wpr_ref[hd * D:(hd + 1) * D, :],
                                 preferred_element_type=jnp.float32)

    x1 = x + yacc_ref[...] + bpr_ref[0]                    # residual 1 (f32)

    # ---------------- MLP branch (row tile only -> bounded (Tq, 4C) intermediate) -------
    h2 = _layernorm(x1, g2_ref[0], b2_ref[0])
    u = jnp.dot(h2.astype(jnp.bfloat16), wfc_ref[...],
                preferred_element_type=jnp.float32) + bfc_ref[0]
    u = _gelu_tanh(u)
    y2 = jnp.dot(u.astype(jnp.bfloat16), wfp_ref[...],
                 preferred_element_type=jnp.float32) + bfp_ref[0]

    o_ref[0] = (x1 + y2).astype(o_ref.dtype)               # residual 2


# --------------------------------------------------------------------------------------
# Wrapper
# --------------------------------------------------------------------------------------
def _pick_row_tile(T, max_tile=256):
    if T <= max_tile:
        return T
    for cand in (256, 128, 64, 32, 16, 8):
        if T % cand == 0:
            return cand
    return T


def gpt2_block(x, params, n_head):
    B, T, C = x.shape
    assert C % n_head == 0
    D = C // n_head
    tq = _pick_row_tile(T)
    assert T % tq == 0
    n_tiles = T // tq

    # Fold 1/sqrt(D) into the Q columns of the QKV projection (zero in-kernel cost).
    scale = 1.0 / math.sqrt(D)
    qscale = jnp.concatenate(
        [jnp.full((1, C), scale, jnp.float32), jnp.ones((1, 2 * C), jnp.float32)], axis=1)
    wqkv_bf = (params["wqkv"] * qscale).astype(jnp.bfloat16)
    bqkv_f32 = (params["bqkv"] * qscale).astype(jnp.float32)

    # Weight matrices in bf16 (MXU-native, half the VMEM); biases / LN params stay f32.
    wpr_bf = params["wproj"].astype(jnp.bfloat16)
    wfc_bf = params["wfc"].astype(jnp.bfloat16)
    wfp_bf = params["wfp"].astype(jnp.bfloat16)
    g1, b1 = params["g1"], params["b1"]
    g2, b2 = params["g2"], params["b2"]
    bproj, bfc, bfp = params["bproj"], params["bfc"], params["bfp"]

    def full_spec(arr):
        nd = arr.ndim
        return pl.BlockSpec(arr.shape, lambda b, i, _nd=nd: (0,) * _nd)

    # ---- pass 1: LN1 + QKV projection (bf16 output, Q pre-scaled) -----------------------
    qkv = pl.pallas_call(
        ln_qkv_kernel,
        out_shape=jax.ShapeDtypeStruct((B, T, 3 * C), jnp.bfloat16),
        grid_spec=pltpu.PrefetchScalarGridSpec(
            num_scalar_prefetch=0,
            grid=(B, n_tiles),
            in_specs=[pl.BlockSpec((1, tq, C), lambda b, i: (b, i, 0)),
                      full_spec(g1), full_spec(b1),
                      full_spec(wqkv_bf), full_spec(bqkv_f32)],
            out_specs=pl.BlockSpec((1, tq, 3 * C), lambda b, i: (b, i, 0)),
        ),
        compiler_params=pltpu.CompilerParams(
            dimension_semantics=("parallel", "parallel")),
    )(x, g1, b1, wqkv_bf, bqkv_f32)

    # ---- pass 2: attention + proj + residual + LN2 + MLP + residual ----------------------
    out = pl.pallas_call(
        functools.partial(attn_mlp_kernel, n_head=n_head),
        out_shape=jax.ShapeDtypeStruct((B, T, C), x.dtype),
        grid_spec=pltpu.PrefetchScalarGridSpec(
            num_scalar_prefetch=0,
            grid=(B, n_tiles),
            in_specs=[
                pl.BlockSpec((1, tq, C), lambda b, i: (b, i, 0)),       # x row tile (residual)
                pl.BlockSpec((1, tq, 3 * C), lambda b, i: (b, i, 0)),   # qkv row tile (for Q)
                pl.BlockSpec((1, T, 3 * C), lambda b, i: (b, 0, 0)),    # full-seq qkv (for K, V)
                full_spec(wpr_bf), full_spec(bproj),
                full_spec(g2), full_spec(b2),
                full_spec(wfc_bf), full_spec(bfc),
                full_spec(wfp_bf), full_spec(bfp),
            ],
            out_specs=pl.BlockSpec((1, tq, C), lambda b, i: (b, i, 0)),
            scratch_shapes=[pltpu.VMEM((tq, C), jnp.float32)],          # attn-proj accumulator
        ),
        compiler_params=pltpu.CompilerParams(
            dimension_semantics=("parallel", "parallel"),
            vmem_limit_bytes=48 * 1024 * 1024),                         # headroom under v7x 64 MiB
    )(x, qkv, qkv, wpr_bf, bproj, g2, b2, wfc_bf, bfc, wfp_bf, bfp)

    return out


# ---------------- pure-JAX reference (for correctness check) ----------------
def gpt2_block_ref(x, params, n_head):
    B, T, C = x.shape
    D = C // n_head

    def ln(h, g, b):
        mu = jnp.mean(h, axis=-1, keepdims=True)
        var = jnp.mean((h - mu) ** 2, axis=-1, keepdims=True)
        return (h - mu) * jax.lax.rsqrt(var + LN_EPS) * g + b

    h = ln(x, params["g1"][0], params["b1"][0])
    qkv = h @ params["wqkv"] + params["bqkv"][0]
    q, k, v = jnp.split(qkv, 3, axis=-1)
    q = q.reshape(B, T, n_head, D).transpose(0, 2, 1, 3)
    k = k.reshape(B, T, n_head, D).transpose(0, 2, 1, 3)
    v = v.reshape(B, T, n_head, D).transpose(0, 2, 1, 3)
    s = jnp.einsum("bhqd,bhkd->bhqk", q, k) / math.sqrt(D)
    mask = jnp.tril(jnp.ones((T, T), dtype=bool))
    s = jnp.where(mask, s, -jnp.inf)
    p = jax.nn.softmax(s, axis=-1)
    y = jnp.einsum("bhqk,bhkd->bhqd", p, v).transpose(0, 2, 1, 3).reshape(B, T, C)
    y = y @ params["wproj"] + params["bproj"][0]
    x1 = x + y
    h2 = ln(x1, params["g2"][0], params["b2"][0])
    u = h2 @ params["wfc"] + params["bfc"][0]
    c = math.sqrt(2.0 / math.pi)
    u = 0.5 * u * (1.0 + jnp.tanh(c * (u + 0.044715 * u ** 3)))
    y2 = u @ params["wfp"] + params["bfp"][0]
    return x1 + y2


if __name__ == "__main__":
    # Small config consistent with the module: n_embd=32, n_head=4, seq T=8, batch 2.
    B, T, C, H = 2, 8, 32, 4

    key = jax.random.PRNGKey(0)
    keys = jax.random.split(key, 8)

    params = {
        "g1":    jnp.ones((1, C), jnp.float32),
        "b1":    jnp.zeros((1, C), jnp.float32),
        "wqkv":  0.02 * jax.random.normal(keys[0], (C, 3 * C), jnp.float32),
        "bqkv":  jnp.zeros((1, 3 * C), jnp.float32),
        "wproj": 0.02 * jax.random.normal(keys[1], (C, C), jnp.float32),
        "bproj": jnp.zeros((1, C), jnp.float32),
        "g2":    jnp.ones((1, C), jnp.float32),
        "b2":    jnp.zeros((1, C), jnp.float32),
        "wfc":   0.02 * jax.random.normal(keys[2], (C, 4 * C), jnp.float32),
        "bfc":   jnp.zeros((1, 4 * C), jnp.float32),
        "wfp":   0.02 * jax.random.normal(keys[3], (4 * C, C), jnp.float32),
        "bfp":   jnp.zeros((1, C), jnp.float32),
    }

    x = jax.random.normal(keys[4], (B, T, C), jnp.float32)

    out = gpt2_block(x, params, H)
    out = jax.block_until_ready(out)

    ref = gpt2_block_ref(x, params, H)
    assert out.shape == (B, T, C)
    # Loose tolerance: kernel uses bf16 MXU operands (f32 accumulation) + approx reciprocal.
    assert jnp.allclose(out, ref, atol=2e-2, rtol=2e-2), "mismatch vs reference"
    assert bool(jnp.all(jnp.isfinite(out))), "non-finite output"

    print("KERNEL_OK")
</pallas_src>

<mosaic_0001>
module attributes {stable_mosaic.version = 11 : i64} {
  func.func @ln_qkv_kernel(%arg0: i32, %arg1: i32, %arg2: memref<1x8x32xf32, #tpu.memory_space<vmem>>, %arg3: memref<1x32xf32, #tpu.memory_space<vmem>>, %arg4: memref<1x32xf32, #tpu.memory_space<vmem>>, %arg5: memref<32x96xbf16, #tpu.memory_space<vmem>>, %arg6: memref<1x96xf32, #tpu.memory_space<vmem>>, %arg7: memref<1x8x96xbf16, #tpu.memory_space<vmem>>) attributes {dimension_semantics = [#tpu.dimension_semantics<parallel>, #tpu.dimension_semantics<parallel>], iteration_bounds = array<i64: 2, 1>, scalar_prefetch = 0 : i64, scratch_operands = 0 : i64, tpu.core_type = #tpu.core_type<tc>, window_params = [{transform_indices = @transform_0, window_bounds = array<i64: 1, 8, 32>}, {pipeline_mode = #tpu.pipeline_mode<synchronous>, transform_indices = @transform_1, window_bounds = array<i64: 1, 32>}, {pipeline_mode = #tpu.pipeline_mode<synchronous>, transform_indices = @transform_2, window_bounds = array<i64: 1, 32>}, {pipeline_mode = #tpu.pipeline_mode<synchronous>, transform_indices = @transform_3, window_bounds = array<i64: 32, 96>}, {pipeline_mode = #tpu.pipeline_mode<synchronous>, transform_indices = @transform_4, window_bounds = array<i64: 1, 96>}, {transform_indices = @transform_5, window_bounds = array<i64: 1, 8, 96>}]} {
    %c0 = arith.constant 0 : index
    %c0_0 = arith.constant 0 : index
    %c0_1 = arith.constant 0 : index
    %0 = vector.load %arg2[%c0, %c0_0, %c0_1] : memref<1x8x32xf32, #tpu.memory_space<vmem>>, vector<1x8x32xf32>
    %1 = vector.shape_cast %0 : vector<1x8x32xf32> to vector<8x32xf32>
    %c0_2 = arith.constant 0 : index
    %c0_3 = arith.constant 0 : index
    %2 = vector.load %arg3[%c0_2, %c0_3] : memref<1x32xf32, #tpu.memory_space<vmem>>, vector<1x32xf32>
    %3 = vector.shape_cast %2 : vector<1x32xf32> to vector<32xf32>
    %c0_4 = arith.constant 0 : index
    %c0_5 = arith.constant 0 : index
    %4 = vector.load %arg4[%c0_4, %c0_5] : memref<1x32xf32, #tpu.memory_space<vmem>>, vector<1x32xf32>
    %5 = vector.shape_cast %4 : vector<1x32xf32> to vector<32xf32>
    %cst = arith.constant dense<0.000000e+00> : vector<8xf32>
    %6 = vector.multi_reduction <add>, %1, %cst [1] : vector<8x32xf32> to vector<8xf32>
    %7 = vector.shape_cast %6 : vector<8xf32> to vector<8x1xf32>
    %cst_6 = arith.constant 3.200000e+01 : f32
    %8 = vector.broadcast %cst_6 : f32 to vector<8x1xf32>
    %9 = arith.divf %7, %8 : vector<8x1xf32>
    %10 = vector.broadcast %9 : vector<8x1xf32> to vector<8x32xf32>
    %11 = arith.subf %1, %10 : vector<8x32xf32>
    %12 = arith.mulf %11, %11 : vector<8x32xf32>
    %cst_7 = arith.constant dense<0.000000e+00> : vector<8xf32>
    %13 = vector.multi_reduction <add>, %12, %cst_7 [1] : vector<8x32xf32> to vector<8xf32>
    %14 = vector.shape_cast %13 : vector<8xf32> to vector<8x1xf32>
    %cst_8 = arith.constant 3.200000e+01 : f32
    %15 = vector.broadcast %cst_8 : f32 to vector<8x1xf32>
    %16 = arith.divf %14, %15 : vector<8x1xf32>
    %17 = vector.broadcast %9 : vector<8x1xf32> to vector<8x32xf32>
    %18 = arith.subf %1, %17 : vector<8x32xf32>
    %cst_9 = arith.constant 9.99999974E-6 : f32
    %19 = vector.broadcast %cst_9 : f32 to vector<8x1xf32>
    %20 = arith.addf %16, %19 : vector<8x1xf32>
    %21 = math.rsqrt %20 : vector<8x1xf32>
    %22 = vector.broadcast %21 : vector<8x1xf32> to vector<8x32xf32>
    %23 = arith.mulf %18, %22 : vector<8x32xf32>
    %24 = vector.shape_cast %3 : vector<32xf32> to vector<1x32xf32>
    %25 = vector.broadcast %24 : vector<1x32xf32> to vector<8x32xf32>
    %26 = arith.mulf %23, %25 : vector<8x32xf32>
    %27 = vector.shape_cast %5 : vector<32xf32> to vector<1x32xf32>
    %28 = vector.broadcast %27 : vector<1x32xf32> to vector<8x32xf32>
    %29 = arith.addf %26, %28 : vector<8x32xf32>
    %30 = arith.truncf %29 : vector<8x32xf32> to vector<8x32xbf16>
    %c0_10 = arith.constant 0 : index
    %c0_11 = arith.constant 0 : index
    %31 = vector.load %arg5[%c0_10, %c0_11] : memref<32x96xbf16, #tpu.memory_space<vmem>>, vector<32x96xbf16>
    %cst_12 = arith.constant dense<0.000000e+00> : vector<8x96xf32>
    %32 = tpu.matmul %30, %31, %cst_12 {dimension_numbers = #tpu.dot_dimension_numbers<[1], [0], [0], [1], [0, 0, 1, 1], [], []>} : vector<8x32xbf16>, vector<32x96xbf16>, vector<8x96xf32> -> vector<8x96xf32>
    %c0_13 = arith.constant 0 : index
    %c0_14 = arith.constant 0 : index
    %33 = vector.load %arg6[%c0_13, %c0_14] : memref<1x96xf32, #tpu.memory_space<vmem>>, vector<1x96xf32>
    %34 = vector.shape_cast %33 : vector<1x96xf32> to vector<96xf32>
    %35 = vector.shape_cast %34 : vector<96xf32> to vector<1x96xf32>
    %36 = vector.broadcast %35 : vector<1x96xf32> to vector<8x96xf32>
    %37 = arith.addf %32, %36 : vector<8x96xf32>
    %38 = arith.truncf %37 : vector<8x96xf32> to vector<8x96xbf16>
    %c0_15 = arith.constant 0 : index
    %c0_16 = arith.constant 0 : index
    %c0_17 = arith.constant 0 : index
    %39 = vector.load %arg7[%c0_15, %c0_16, %c0_17] : memref<1x8x96xbf16, #tpu.memory_space<vmem>>, vector<1x8x96xbf16>
    %40 = vector.shape_cast %39 : vector<1x8x96xbf16> to vector<8x96xbf16>
    %41 = vector.shape_cast %38 : vector<8x96xbf16> to vector<1x8x96xbf16>
    tpu.vector_store %arg7[%c0_15, %c0_16, %c0_17], %41 {strides = array<i32>} : memref<1x8x96xbf16, #tpu.memory_space<vmem>>, vector<1x8x96xbf16>,
    return
  }
  func.func @transform_0(%arg0: i32, %arg1: i32) -> (i32, i32, i32) {
    %c0_i32 = arith.constant 0 : i32
    %c0_i32_0 = arith.constant 0 : i32
    return %arg0, %arg1, %c0_i32 : i32, i32, i32
  }
  func.func @transform_1(%arg0: i32, %arg1: i32) -> (i32, i32) {
    %c0_i32 = arith.constant 0 : i32
    %c0_i32_0 = arith.constant 0 : i32
    %c0_i32_1 = arith.constant 0 : i32
    return %c0_i32, %c0_i32_0 : i32, i32
  }
  func.func @transform_2(%arg0: i32, %arg1: i32) -> (i32, i32) {
    %c0_i32 = arith.constant 0 : i32
    %c0_i32_0 = arith.constant 0 : i32
    %c0_i32_1 = arith.constant 0 : i32
    return %c0_i32, %c0_i32_0 : i32, i32
  }
  func.func @transform_3(%arg0: i32, %arg1: i32) -> (i32, i32) {
    %c0_i32 = arith.constant 0 : i32
    %c0_i32_0 = arith.constant 0 : i32
    %c0_i32_1 = arith.constant 0 : i32
    return %c0_i32, %c0_i32_0 : i32, i32
  }
  func.func @transform_4(%arg0: i32, %arg1: i32) -> (i32, i32) {
    %c0_i32 = arith.constant 0 : i32
    %c0_i32_0 = arith.constant 0 : i32
    %c0_i32_1 = arith.constant 0 : i32
    return %c0_i32, %c0_i32_0 : i32, i32
  }
  func.func @transform_5(%arg0: i32, %arg1: i32) -> (i32, i32, i32) {
    %c0_i32 = arith.constant 0 : i32
    %c0_i32_0 = arith.constant 0 : i32
    return %arg0, %arg1, %c0_i32 : i32, i32, i32
  }
}

</mosaic_0001>

<bundles_post_ra>
// kernel: tpu_custom_call.1
= control target key start
LH: loop header
LB: loop body
LE: loop exit
PB: predicated region body
PF: predicated region fallthrough
CT: control target
= control target key end

     0   :  { %10 = vsyncpa [#allocation3], 0  ;;  %s1003_s0 = inlined_call_operand.hbm [shape: f32[2,8,32], index: 0, kind: input, shape index: {}]   ;;  %s1004_s1 = inlined_call_operand.vmem [shape: f32[1,32], index: 1, kind: input, shape index: {}]   ;;  %s1005_s2 = inlined_call_operand.vmem [shape: f32[1,32], index: 2, kind: input, shape index: {}]   ;;  %s1006_s3 = inlined_call_operand.hbm [shape: bf16[32,96], index: 3, kind: input, shape index: {}]   ;;  %s1007_s4 = inlined_call_operand.vmem [shape: f32[1,96], index: 4, kind: input, shape index: {}]   ;;  %s1008_s5 = inlined_call_operand.hbm [shape: bf16[2,8,96], index: 5, kind: output, shape index: {}]  }
   0x1   :  { %12 = vsyncpa [#allocation3 + $0x1], 0 }
   0x2   :  { %13 = vsyncpa [#allocation6], 0 }
   0x3   :  { %14 = vsyncpa [#allocation4], 0 }
   0x4   :  { %16 = vsyncpa [#allocation4 + $0x1], 0  ;;  %s776_s18 = smov 0   ;;  %s778_s19 = smov 0  }
   0x5   :  { %s780_s20 = smov 0   ;;  %s782_s21 = smov 0  }
   0x6   :  { %s784_s22 = smov 0   ;;  %s786_s23 = smov 0  }
   0x7 LB: > { %s480_s24 = sadd.s32 4294967295, %s737_s23   ;;  %s481_s25 = sadd.s32 4294967294, %s737_s23   ;;  %s737_s23 = sphi %s786_s23, %s22_s23   ;;  %s733_s22 = sphi %s784_s22, %s1032_s22   ;;  %s729_s21 = sphi %s782_s21, %s1031_s21   ;;  %s725_s20 = sphi %s780_s20, %s1030_s20   ;;  %s721_s19 = sphi %s778_s19, %s1029_s19   ;;  %s717_s18 = sphi %s776_s18, %s1028_s18  }
   0x8   : > { %p56_p0 = scmp.ne.s32.totalorder %s721_s19, %s717_s18  ;;  %p810_p1 = scmp.eq.s32.totalorder %s480_s24, 0 }
   0x9   : > { %p814_p2 = scmp.eq.s32.totalorder %s480_s24, 1  ;;  %p172_p3 = scmp.eq.s32.totalorder %s481_s25, 1 }
   0xa   : > { %s1013_s26 = scalar_select %p810_p1, 1, 0 }
   0xb   : > { %s1014_s27 = scalar_select %p814_p2, 1, 0 }
   0xc   : > { %p820_p4 = por %p810_p1, %p56_p0  ;;  %p482_p5 = scmp.ge.s32.totalorder %s737_s23, 1 }
   0xd   : > { %p825_p6 = por %p172_p3, %p56_p0  ;;  %p179_p7 = scmp.lt.s32.totalorder %s737_s23, 3 }
   0xe   : > { %s1015_s28 = scalar_select %p820_p4, 1, 0 }
   0xf   : > { %s1016_s29 = scalar_select %p825_p6, 1, 0 }
  0x10   : > { %p830_p8 = pnand %p482_p5, %p179_p7  ;;  %s739_s6 = smov [#allocation5]  }
  0x11   : > { %s197_s7 = sshll.u32 %s739_s6, 4  ;;  %s34_s9 = sadd.s32 1, %s733_s22  ;;  %s198_s7 = int_to_ptr.vmem [resolvable:$true] %s197_s7 }
  0x12   : > { %s1017_s30 = scalar_select %p830_p8, 1, 0 }
  0x13   : > { %p520_p9 = pneg %p830_p8  ;;  %s593_s12 = scalar_lea.hbm %s1006_s3, 256 }
  0x14   : > { %p594_p12 = scmp.ne.s32.totalorder %s1006_s3, %s593_s12  ;;  %p600_p5 = scmp.lt.u32.totalorder %s593_s12, %s1006_s3 }
  0x15   : > { %p839_p11 = pnand %p520_p9, %p810_p1 }
  0x17   : > { %p595_p13 = pneg %p839_p11 }
  0x19   : > { %p596_p0 = pnand %p595_p13, %p594_p12 }
  0x1b   : > { %p597_p3 = pneg %p596_p0 }
  0x1d   : > { %p602_p7 = pnand %p600_p5, %p597_p3 }
  0x1f   : > { %605 = shalt.err (!%p602_p7)
}
  0x20   : > { %s606_s17 = scalar_lea.vmem %s198_s7, 256  ;;  %p614_p1 = scmp.lt.s32.totalorder %s198_s7, %s198_s7 }
  0x21   : > { %p607_p9 = scmp.ne.s32.totalorder %s198_s7, %s606_s17  ;;  %p615_p4 = scmp.lt.s32.totalorder %s606_s17, %s606_s17 }
  0x23   : > { %p609_p10 = pnand %p607_p9, %p595_p13  ;;  %p616_p8 = por %p615_p4, %p614_p1 }
  0x25   : > { %p610_p6 = pneg %p609_p10 }
  0x27   : > { %p617_p2 = pnand %p616_p8, %p610_p6 }
  0x29   : > { %620 = shalt.err (!%p617_p2)
}
  0x2a   : > { %s740_s24 = smov 64   ;;  %s741_s25 = smov 4  }
  0x2b   : > { %523 = dma.hbm_to_vmem [thread:$0]  (!%p839_p11), %s1006_s3, 256, %s198_s7, [#allocation6], %s740_s24, %s740_s24, %s741_s25  }
  0x2c   : > { %p36_p1 = scmp.ge.s32.totalorder %s34_s9, 2  ;;  %s43_s11 = sadd.s32 1, %s725_s20 }
  0x2d   : > { %p50_p2 = scmp.ne.s32.totalorder %s725_s20, %s721_s19  ;;  %p51_p4 = scmp.eq.s32.totalorder %s737_s23, 0 }
  0x2e   : > { %s1034_s9 = smov (%p36_p1, %s34_s9), 0  ;;  %p1020_p8 = scmp.ne.s32.totalorder %s1014_s27, 0 }
  0x2f   : > { %p866_p6 = por %p51_p4, %p50_p2  ;;  %s38_s8 = ssub.s32 %s733_s22, %s1034_s9 }
  0x30   : > { %p872_p10 = por %p1020_p8, %p50_p2  ;;  %p533_p12 = scmp.lt.s32.totalorder %s737_s23, 2 }
  0x31   : > { %p41_p11 = scmp.eq.s32.totalorder %s38_s8, 0  ;;  %s214_s7 = sand.u32 1, %s725_s20  }
  0x32   : > { %s485_s14 = sshll.u32 %s214_s7, 3  ;;  %s486_s16 = sshll.u32 %s733_s22, 7 }
  0x33   : > { %s881_s15 = scalar_select %p41_p11, %s725_s20, %s43_s11  }
  0x34   : > { %s887_s25 = scalar_lea.hbm %s1003_s0, %s486_s16  ;;  %s218_s27 = scalar_lea.vmem [#allocation2], %s485_s14 }
  0x35   : > { %s226_s6 = sshll.u32 %s218_s27, 4  ;;  %p893_p13 = pnand %p533_p12, %p866_p6  ;;  %s889_s6 = int_to_ptr.vmem [resolvable:$true] %s226_s6 }
  0x36   : > { %s215_s11 = scalar_lea.sflag [#allocation3], %s214_s7  ;;  %s621_s8 = scalar_lea.hbm %s887_s25, 128 }
  0x37   : > { %p622_p0 = scmp.ne.s32.totalorder %s887_s25, %s621_s8  ;;  %p623_p3 = pneg %p893_p13 }
  0x38   : > { %s626_s17 = scalar_lea.hbm %s1003_s0, 256  ;;  %p627_p9 = scmp.lt.u32.totalorder %s887_s25, %s1003_s0 }
  0x39   : > { %p624_p5 = pnand %p623_p3, %p622_p0  ;;  %p628_p1 = scmp.lt.u32.totalorder %s626_s17, %s621_s8 }
  0x3a   : > { %p630_p4 = scmp.lt.u32.totalorder %s621_s8, %s887_s25 }
  0x3b   : > { %p625_p7 = pneg %p624_p5  ;;  %p629_p2 = por %p628_p1, %p627_p9 }
  0x3d   : > { %p631_p6 = por %p630_p4, %p629_p2 }
  0x3f   : > { %p632_p8 = pnand %p631_p6, %p625_p7 }
  0x41   : > { %635 = shalt.err (!%p632_p8)
}
  0x42   : > { %s636_s7 = scalar_lea.vmem %s889_s6, 128  ;;  %s742_s27 = smov [#allocation2]  }
  0x43   : > { %p637_p12 = scmp.ne.s32.totalorder %s889_s6, %s636_s7  ;;  %s641_s14 = sshll.u32 %s742_s27, 4  ;;  %s642_s14 = int_to_ptr.vmem [resolvable:$false] %s641_s14 }
  0x44   : > { %s643_s16 = scalar_lea.vmem %s642_s14, 256  ;;  %p644_p5 = scmp.lt.s32.totalorder %s889_s6, %s642_s14 }
  0x45   : > { %p639_p11 = pnand %p637_p12, %p623_p3  ;;  %p645_p9 = scmp.lt.s32.totalorder %s643_s16, %s636_s7 }
  0x47   : > { %p640_p0 = pneg %p639_p11  ;;  %p646_p1 = por %p645_p9, %p644_p5 }
  0x49   : > { %p647_p2 = pnand %p646_p1, %p640_p0 }
  0x4b   : > { %650 = shalt.err (!%p647_p2)
}
  0x4c   : > { %527 = dma.hbm_to_vmem [thread:$0]  (!%p893_p13), %s887_s25, 128, %s889_s6, %s215_s11  }
  0x4d   : > { %p1023_p7 = scmp.ne.s32.totalorder %s1017_s30, 0 }
  0x4e   : > { %s925_s8 = sand.u32 (!%p1023_p7), 1, %s721_s19   ;;  %p1024_p3 = scmp.ne.s32.totalorder (!%p1023_p7), %s1015_s28, 0 }
  0x4f   : > { %235 = sbr.rel (%p1023_p7) target bundleno = 636 (0x27c), region = 40  ;;  %s488_s17 = sshll.u32 (!%p1023_p7), %s925_s8, 3 }
  0x50   : > { %s238_s12 = scalar_lea.sflag (!%p1023_p7), [#allocation3], %s925_s8  ;;  %s241_s24 = scalar_lea.vmem (!%p1023_p7), [#allocation2], %s488_s17 }
  0x56   : > { %704 = dma.done.wait (%p1024_p3), %s238_s12, 128  }
  0x57   : > { %706 = vsyncadd (%p1024_p3), %s238_s12, 4294967168  ;;  %p1025_p4 = scmp.ne.s32.totalorder %s1013_s26, 0 }
  0x59   : > { %708 = dma.done.wait (%p1025_p4), [#allocation6], 256  }
  0x5a   : > { %710 = vsyncadd (%p1025_p4), [#allocation6], 4294967040  ;;  %vm276_vm0 = vcmask 261120   ;;  %v273_v0 = vld [vmem:[%s241_s24] sm:$0xff]  ;;  %v589_v7 = vld [vmem:[#allocation5] sm:$0xff]   ;;  %v743_v8 = vmov 0.0  }
  0x5b   : > { %v277_v1 = vsel %vm276_vm0, %v273_v0, 0.0  ;;  %504 = vmatprep.subr.bf16.mxu0 %v743_v8  ;;  %v590_v9 = vld [vmem:[#allocation5 + $0x8] sm:$0xff]   ;;  %vm744_vm1 = vmmov 0   ;;  %v491_v14 = vld [vmem:[%s1004_s1] ss:$0 sm:$0xff]  ;;  %s490_s6 = sshll.u32 %s925_s8, 2 }
  0x5c   : > { %278 = vadd.xlane.f32.xlu0 %v277_v1  ;;  %505 = vmatpush3.bf16.msra.mxu0 %v589_v7  ;;  %v492_v16 = vld [vmem:[%s1005_s2] ss:$0 sm:$0xff]  ;;  %s498_s7 = sshll.u32 %s729_s21, 6  ;;  %s271_s27 = scalar_lea.vmem [#allocation7], %s490_s6  ;;  %vm373_vm2 = vcmask 781312  }
  0x5d   : > { %508 = vmatprep.mubr.msk.bf16.mxu0 %vm744_vm1, %v743_v8  ;;  %506 = vmatprep.subr.bf16.mxu0 %v743_v8  ;;  %v493_v20 = vld [vmem:[%s1007_s4] ss:$0 sm:$0xff]  ;;  %s390_s14 = sshll.u32 %s271_s27, 4  ;;  %s954_s12 = scalar_lea.hbm %s1008_s5, %s498_s7  ;;  %s956_s14 = int_to_ptr.vmem [resolvable:$true] %s390_s14 }
  0x5e   : > { %s376_s21 = scalar_lea.sflag [#allocation4], %s925_s8  ;;  %s651_s24 = scalar_lea.vmem %s956_s14, 64 }
  0x5f   : > { %p652_p13 = scmp.ne.s32.totalorder %s956_s14, %s651_s24  ;;  %s745_s26 = smov [#allocation7]  }
  0x60   : > { %507 = vmatpush3.bf16.msra.mxu0 %v590_v9  ;;  %s655_s28 = sshll.u32 %s745_s26, 4  ;;  %s656_s28 = int_to_ptr.vmem [resolvable:$false] %s655_s28 }
  0x61   : > { %p653_p6 = pnand %p652_p13, %p872_p10  ;;  %s657_s30 = scalar_lea.vmem %s656_s28, 128 }
  0x62   : > { %p658_p12 = scmp.lt.s32.totalorder %s956_s14, %s656_s28  ;;  %p659_p11 = scmp.lt.s32.totalorder %s657_s30, %s651_s24 }
  0x63   : > { %p654_p8 = pneg %p653_p6 }
  0x64   : > { %p660_p0 = por %p659_p11, %p658_p12 }
  0x66   : > { %p661_p5 = pnand %p660_p0, %p654_p8 }
  0xe9   : > { %v279_v2 = vpop.xlane.xlu0 %278 }
  0xea   : > { %v281_v3 = vmul.f32 0.03125, %v279_v2 }
  0xec   : > { %v282_v4 = vsub.f32 %v273_v0, %v281_v3 }
  0xee   : > { %v283_v5 = vmul.f32 %v282_v4, %v282_v4 }
  0xf0   : > { %v284_v6 = vsel %vm276_vm0, %v283_v5, 0.0 }
  0xf1   : > { %285 = vadd.xlane.f32.xlu0 %v284_v6 }
 0x17e   : > { %v286_v10 = vpop.xlane.xlu0 %285 }
 0x17f   : > { %v287_v11 = vmul.f32 0.03125, %v286_v10 }
 0x181   : > { %v288_v12 = vadd.f32 1e-05, %v287_v11 }
 0x183   : > { %591 = vrsqrt.f32 %v288_v12 }
 0x18d   : > { %v592_v13 = vpop.eup %591 }
 0x18e   : > { %v290_v15 = vmul.f32 %v592_v13, %v282_v4 }
 0x190   : > { %v297_v17 = vmul.f32 %v491_v14, %v290_v15 }
 0x192   : > { %v304_v18 = vadd.f32 %v492_v16, %v297_v17 }
 0x194   : > { %v305_v19 = vpack.c.bf16 %v304_v18, %v304_v18 }
 0x196   : > { %509 = vmatmul.mubr.msk.bf16.vlgmr.msra.gmra.mrb[0].mxu0 %vm276_vm0, %v305_v19 }
 0x269   : > { %v366_v21 = vpop.f32.mrb[0].mxu0 }
 0x26a   : > { %v367_v22 = vadd.f32 %v493_v20, %v366_v21  ;;  %v510_v23 = vpop.f32.mrb[1].mxu0 }
 0x26b   : > { %v369_v24 = vpop.f32.mrb[2].mxu0 }
 0x26c   : > { %v372_v25 = vpack.c.bf16 %v367_v22, %v367_v22  ;;  %v511_v26 = vpop.f32.mrb[3].mxu0 }
 0x26e   : > { %374 = vst.msk [vmem:[%s271_s27] sm:$0xf] %vm373_vm2, %v372_v25 }
 0x26f   : > { %664 = shalt.err (!%p661_p5)
}
 0x270   : > { %s665_s8 = scalar_lea.hbm %s954_s12, 64  ;;  %s669_s10 = scalar_lea.hbm %s1008_s5, 128 }
 0x271   : > { %p666_p9 = scmp.ne.s32.totalorder %s954_s12, %s665_s8  ;;  %p670_p7 = scmp.lt.u32.totalorder %s954_s12, %s1008_s5 }
 0x272   : > { %p671_p3 = scmp.lt.u32.totalorder %s669_s10, %s665_s8  ;;  %p673_p13 = scmp.lt.u32.totalorder %s665_s8, %s954_s12 }
 0x273   : > { %p667_p1 = pnand %p666_p9, %p872_p10 }
 0x274   : > { %p672_p4 = por %p671_p3, %p670_p7 }
 0x275   : > { %p668_p2 = pneg %p667_p1 }
 0x276   : > { %p674_p6 = por %p673_p13, %p672_p4 }
 0x278   : > { %p675_p8 = pnand %p674_p6, %p668_p2 }
 0x27a   : > { %678 = shalt.err (!%p675_p8)
}
 0x27b   : > { %518 = dma.vmem_to_hbm [thread:$0]  (%p872_p10), %s956_s14, 64, %s954_s12, %s376_s21  }
 0x27c PF: > { %s402_s27 = sand.u32 1, %s717_s18   ;;  %p1026_p12 = scmp.ne.s32.totalorder %s1016_s29, 0 }
 0x27d   : > { %p1027_p11 = scmp.ge.s32.totalorder %s737_s23, 2  ;;  %s403_s16 = scalar_lea.sflag [#allocation4], %s402_s27 }
 0x27f   : > { %p529_p0 = pnand %p1027_p11, %p1026_p12 }
 0x281   : > { %712 = dma.done.wait (!%p529_p0), %s403_s16, 64  }
 0x282   : > { %714 = vsyncadd (!%p529_p0), %s403_s16, 4294967232  ;;  %s22_s23 = sadd.s32 1, %s737_s23   ;;  %s1028_s18 = smov %s721_s19 }
 0x283   : > { %p19_p5 = scmp.ge.s32.totalorder %s22_s23, 4   ;;  %s1029_s19 = smov %s725_s20 }
 0x284   : > { %s1030_s20 = smov %s881_s15  ;;  %s1031_s21 = smov %s733_s22 }
 0x285   : > { %s1032_s22 = smov %s1034_s9  ;;  %21 = sbr.rel (!%p19_p5) target bundleno = 7 (0x7), region = 89 }
 0x28c   :  { %408 = vsyncpa [#allocation3], 1 }
 0x28d   :  { %410 = vsyncpa [#allocation3 + $0x1], 1 }
 0x28e   :  { %411 = vsyncpa [#allocation6], 1 }
 0x28f   :  { %412 = vsyncpa [#allocation4], 1 }
 0x290   :  { %414 = vsyncpa [#allocation4 + $0x1], 1 }

</bundles_post_ra>
